<compile_context>
chip_gen: v7x
topology: tpu7x:2x2x1
jax: 0.10.0
libtpu: 0.0.40
codegen_flags: <defaults>
</compile_context>

<pallas_src>
import math

import jax
import jax.numpy as jnp
from jax.experimental import pallas as pl
from jax.experimental.pallas import tpu as pltpu

_NEG = -1e30  # mask for padded class lanes (finite, so no inf - inf NaNs)


def _round_up(x, m):
    return ((x + m - 1) // m) * m


# --------------------------------------------------------------------------
# Kernel: one (study, batch_tile) grid point.
#   x_ref : (1, TB, F_pad)    bf16  input rows
#   w_ref : (1, F_pad, C_pad) bf16  collapsed weight (resident across batch)
#   b_ref : (1, 1, C_pad)     f32   bias, padded lanes pre-filled with -1e30
#   out   : (1, TB, C_pad)    f32   lane-dense log-probabilities
# --------------------------------------------------------------------------
def _fused_multitask_kernel(x_ref, w_ref, b_ref, out_ref):
    logits = jnp.dot(x_ref[0], w_ref[0],
                     preferred_element_type=jnp.float32)        # (TB, C_pad) f32
    logits = logits + b_ref[0]                                  # masks padded lanes
    # log_softmax over the class axis (dim=1 in the PyTorch module).
    m = jnp.max(logits, axis=-1, keepdims=True)
    shifted = logits - m
    lse = jnp.log(jnp.sum(jnp.exp(shifted), axis=-1, keepdims=True))
    out_ref[0] = shifted - lse


def fused_multitask_forward(x_all, w_all, b_all, tb):
    """x_all: (S, B_pad, F_pad) bf16, w_all: (S, F_pad, C_pad) bf16,
    b_all: (S, 1, C_pad) f32  ->  (S, B_pad, C_pad) f32 log-probs."""
    s, b_pad, f_pad = x_all.shape
    c_pad = w_all.shape[-1]
    assert b_pad % tb == 0
    return pl.pallas_call(
        _fused_multitask_kernel,
        out_shape=jax.ShapeDtypeStruct((s, b_pad, c_pad), jnp.float32),
        grid_spec=pltpu.PrefetchScalarGridSpec(
            num_scalar_prefetch=0,
            grid=(s, b_pad // tb),
            in_specs=[
                pl.BlockSpec((1, tb, f_pad), lambda i, j: (i, j, 0)),
                pl.BlockSpec((1, f_pad, c_pad), lambda i, j: (i, 0, 0)),
                pl.BlockSpec((1, 1, c_pad), lambda i, j: (i, 0, 0)),
            ],
            out_specs=pl.BlockSpec((1, tb, c_pad), lambda i, j: (i, j, 0)),
        ),
        compiler_params=pltpu.CompilerParams(
            dimension_semantics=("parallel", "parallel")),
    )(x_all, w_all, b_all)


def xavier_uniform(key, shape):
    # Matches torch.nn.init.xavier_uniform for a 2D (out, in) weight.
    fan_out, fan_in = shape
    bound = math.sqrt(6.0 / (fan_in + fan_out))
    return jax.random.uniform(key, shape, dtype=jnp.float32,
                              minval=-bound, maxval=bound)


class MultiTaskModuleJAX:
    """Parameter container + fused Pallas forward (skip_connection=False, p=0)."""

    def __init__(self, key, in_features, shared_embedding_size, target_sizes):
        self.in_features = in_features
        self.shared_embedding_size = shared_embedding_size
        self.target_sizes = dict(target_sizes)
        self.study_order = sorted(target_sizes.keys())

        keys = jax.random.split(key, 1 + len(self.study_order))
        # shared_embedder: Linear(F, E, bias=False) -> weight (E, F)
        w_embed = xavier_uniform(keys[0], (shared_embedding_size, in_features))
        self.w_embed_t = jnp.transpose(w_embed)                    # (F, E)

        self.f_pad = _round_up(in_features, 128)
        max_c = max(target_sizes.values())
        self.c_pad = _round_up(max_c, 128)

        # Per-study: classifier weight (C, E), bias zeros; collapse with the
        # shared embedder (valid for the eval / p=0 / no-skip path).
        self.w_cls_t = {}
        self.b_cls = {}
        self.w_collapsed = {}                                      # (F, C) f32
        w_all = []
        b_all = []
        for i, study in enumerate(self.study_order):
            size = target_sizes[study]
            w_cls = xavier_uniform(keys[1 + i], (size, shared_embedding_size))
            w_cls_t = jnp.transpose(w_cls)                         # (E, C)
            b = jnp.zeros((size,), dtype=jnp.float32)              # bias filled 0.0
            self.w_cls_t[study] = w_cls_t
            self.b_cls[study] = b

            w_fold = self.w_embed_t @ w_cls_t                      # (F, C) f32
            self.w_collapsed[study] = w_fold

            w_pad = jnp.zeros((self.f_pad, self.c_pad), dtype=jnp.float32)
            w_pad = w_pad.at[:in_features, :size].set(w_fold)
            w_all.append(w_pad.astype(jnp.bfloat16))

            b_pad = jnp.full((1, self.c_pad), _NEG, dtype=jnp.float32)
            b_pad = b_pad.at[0, :size].set(b)
            b_all.append(b_pad)

        self.w_all = jnp.stack(w_all, axis=0)                      # (S, F_pad, C_pad) bf16
        self.b_all = jnp.stack(b_all, axis=0)[:, None, :][:, 0:1, :]  # (S, 1, C_pad) f32
        self.b_all = jnp.stack(b_all, axis=0).reshape(
            len(self.study_order), 1, self.c_pad)

    def forward(self, inputs):
        # NOTE: dropout / input_dropout are identity here (p=0.0 / eval mode).
        studies = self.study_order
        batches = {s: inputs[s].shape[0] for s in studies}
        max_b = max(batches.values())
        if max_b <= 128:
            tb = _round_up(max_b, 8)
            b_pad = tb
        else:
            tb = 128
            b_pad = _round_up(max_b, 128)

        # Stack + zero-pad all study inputs into one (S, B_pad, F_pad) slab.
        x_all = jnp.zeros((len(studies), b_pad, self.f_pad), dtype=jnp.bfloat16)
        for i, s in enumerate(studies):
            x = inputs[s].astype(jnp.bfloat16)
            x_all = x_all.at[i, :x.shape[0], :x.shape[1]].set(x)

        out = fused_multitask_forward(x_all, self.w_all, self.b_all, tb)

        preds = {}
        for i, s in enumerate(studies):
            preds[s] = out[i, :batches[s], :self.target_sizes[s]]
        return preds


def forward_reference_matched(module, inputs):
    """Pure-JAX reference using the SAME bf16 collapsed-weight math as the kernel."""
    preds = {}
    for study, x in inputs.items():
        w = module.w_collapsed[study].astype(jnp.bfloat16)
        logits = jnp.dot(x.astype(jnp.bfloat16), w,
                         preferred_element_type=jnp.float32)
        logits = logits + module.b_cls[study][None, :]
        preds[study] = jax.nn.log_softmax(logits, axis=1)
    return preds


def forward_reference_f32(module, inputs):
    """Full-f32 two-matmul reference mirroring the original PyTorch module."""
    preds = {}
    for study, x in inputs.items():
        emb = x @ module.w_embed_t
        logits = emb @ module.w_cls_t[study] + module.b_cls[study][None, :]
        preds[study] = jax.nn.log_softmax(logits, axis=1)
    return preds


if __name__ == "__main__":
    key = jax.random.PRNGKey(0)

    in_features = 32
    shared_embedding_size = 16
    target_sizes = {"study_a": 8, "study_b": 5}
    batch = 4

    k_mod, k_a, k_b = jax.random.split(key, 3)
    module = MultiTaskModuleJAX(k_mod, in_features, shared_embedding_size,
                                target_sizes)

    inputs = {
        "study_a": jax.random.normal(k_a, (batch, in_features), dtype=jnp.float32),
        "study_b": jax.random.normal(k_b, (batch, in_features), dtype=jnp.float32),
    }

    preds = module.forward(inputs)
    for p in preds.values():
        jax.block_until_ready(p)

    # Exact check against a reference doing the same bf16 collapsed-weight math.
    ref = forward_reference_matched(module, inputs)
    # Loose semantic check against the original f32 two-matmul PyTorch path.
    ref_f32 = forward_reference_f32(module, inputs)

    for study in preds:
        assert preds[study].shape == (batch, target_sizes[study])
        err = float(jnp.max(jnp.abs(preds[study] - ref[study])))
        assert err < 1e-4, f"{study}: max abs err vs matched ref {err}"
        err32 = float(jnp.max(jnp.abs(preds[study] - ref_f32[study])))
        assert err32 < 5e-2, f"{study}: max abs err vs f32 ref {err32}"
        # Each row of log-probs must exp-sum to 1.
        row_sum = jnp.sum(jnp.exp(preds[study]), axis=1)
        assert float(jnp.max(jnp.abs(row_sum - 1.0))) < 1e-4

    print("KERNEL_OK")
</pallas_src>

<mosaic_0001>
module attributes {stable_mosaic.version = 11 : i64} {
  func.func @_fused_multitask_kernel(%arg0: i32, %arg1: i32, %arg2: memref<1x8x128xbf16, #tpu.memory_space<vmem>>, %arg3: memref<1x128x128xbf16, #tpu.memory_space<vmem>>, %arg4: memref<1x1x128xf32, #tpu.memory_space<vmem>>, %arg5: memref<1x8x128xf32, #tpu.memory_space<vmem>>) attributes {dimension_semantics = [#tpu.dimension_semantics<parallel>, #tpu.dimension_semantics<parallel>], iteration_bounds = array<i64: 2, 1>, scalar_prefetch = 0 : i64, scratch_operands = 0 : i64, tpu.core_type = #tpu.core_type<tc>, window_params = [{transform_indices = @transform_0, window_bounds = array<i64: 1, 8, 128>}, {transform_indices = @transform_1, window_bounds = array<i64: 1, 128, 128>}, {transform_indices = @transform_2, window_bounds = array<i64: 1, 1, 128>}, {transform_indices = @transform_3, window_bounds = array<i64: 1, 8, 128>}]} {
    %c0 = arith.constant 0 : index
    %c0_0 = arith.constant 0 : index
    %c0_1 = arith.constant 0 : index
    %0 = vector.load %arg2[%c0, %c0_0, %c0_1] : memref<1x8x128xbf16, #tpu.memory_space<vmem>>, vector<1x8x128xbf16>
    %1 = vector.shape_cast %0 : vector<1x8x128xbf16> to vector<8x128xbf16>
    %c0_2 = arith.constant 0 : index
    %c0_3 = arith.constant 0 : index
    %c0_4 = arith.constant 0 : index
    %2 = vector.load %arg3[%c0_2, %c0_3, %c0_4] : memref<1x128x128xbf16, #tpu.memory_space<vmem>>, vector<1x128x128xbf16>
    %3 = vector.shape_cast %2 : vector<1x128x128xbf16> to vector<128x128xbf16>
    %cst = arith.constant dense<0.000000e+00> : vector<8x128xf32>
    %4 = tpu.matmul %1, %3, %cst {dimension_numbers = #tpu.dot_dimension_numbers<[1], [0], [0], [1], [0, 0, 1, 1], [], []>} : vector<8x128xbf16>, vector<128x128xbf16>, vector<8x128xf32> -> vector<8x128xf32>
    %c0_5 = arith.constant 0 : index
    %c0_6 = arith.constant 0 : index
    %c0_7 = arith.constant 0 : index
    %5 = vector.load %arg4[%c0_5, %c0_6, %c0_7] : memref<1x1x128xf32, #tpu.memory_space<vmem>>, vector<1x1x128xf32>
    %6 = vector.shape_cast %5 : vector<1x1x128xf32> to vector<1x128xf32>
    %7 = vector.broadcast %6 : vector<1x128xf32> to vector<8x128xf32>
    %8 = arith.addf %4, %7 : vector<8x128xf32>
    %cst_8 = arith.constant dense<0xFF800000> : vector<8xf32>
    %9 = vector.multi_reduction <maximumf>, %8, %cst_8 [1] : vector<8x128xf32> to vector<8xf32>
    %10 = vector.shape_cast %9 : vector<8xf32> to vector<8x1xf32>
    %11 = vector.broadcast %10 : vector<8x1xf32> to vector<8x128xf32>
    %12 = arith.subf %8, %11 : vector<8x128xf32>
    %13 = math.exp %12 : vector<8x128xf32>
    %cst_9 = arith.constant dense<0.000000e+00> : vector<8xf32>
    %14 = vector.multi_reduction <add>, %13, %cst_9 [1] : vector<8x128xf32> to vector<8xf32>
    %15 = vector.shape_cast %14 : vector<8xf32> to vector<8x1xf32>
    %16 = math.log %15 : vector<8x1xf32>
    %17 = vector.broadcast %16 : vector<8x1xf32> to vector<8x128xf32>
    %18 = arith.subf %12, %17 : vector<8x128xf32>
    %c0_10 = arith.constant 0 : index
    %c0_11 = arith.constant 0 : index
    %c0_12 = arith.constant 0 : index
    %19 = vector.load %arg5[%c0_10, %c0_11, %c0_12] : memref<1x8x128xf32, #tpu.memory_space<vmem>>, vector<1x8x128xf32>
    %20 = vector.shape_cast %19 : vector<1x8x128xf32> to vector<8x128xf32>
    %21 = vector.shape_cast %18 : vector<8x128xf32> to vector<1x8x128xf32>
    tpu.vector_store %arg5[%c0_10, %c0_11, %c0_12], %21 {strides = array<i32>} : memref<1x8x128xf32, #tpu.memory_space<vmem>>, vector<1x8x128xf32>,
    return
  }
  func.func @transform_0(%arg0: i32, %arg1: i32) -> (i32, i32, i32) {
    %c0_i32 = arith.constant 0 : i32
    %c0_i32_0 = arith.constant 0 : i32
    return %arg0, %arg1, %c0_i32 : i32, i32, i32
  }
  func.func @transform_1(%arg0: i32, %arg1: i32) -> (i32, i32, i32) {
    %c0_i32 = arith.constant 0 : i32
    %c0_i32_0 = arith.constant 0 : i32
    %c0_i32_1 = arith.constant 0 : i32
    return %arg0, %c0_i32, %c0_i32_0 : i32, i32, i32
  }
  func.func @transform_2(%arg0: i32, %arg1: i32) -> (i32, i32, i32) {
    %c0_i32 = arith.constant 0 : i32
    %c0_i32_0 = arith.constant 0 : i32
    %c0_i32_1 = arith.constant 0 : i32
    return %arg0, %c0_i32, %c0_i32_0 : i32, i32, i32
  }
  func.func @transform_3(%arg0: i32, %arg1: i32) -> (i32, i32, i32) {
    %c0_i32 = arith.constant 0 : i32
    %c0_i32_0 = arith.constant 0 : i32
    return %arg0, %arg1, %c0_i32 : i32, i32, i32
  }
}

</mosaic_0001>

<bundles_post_ra>
// kernel: tpu_custom_call.1
= control target key start
LH: loop header
LB: loop body
LE: loop exit
PB: predicated region body
PF: predicated region fallthrough
CT: control target
= control target key end

     0   :  { %8 = vsyncpa [#allocation3], 0  ;;  %s1054_s0 = inlined_call_operand.hbm [shape: bf16[2,8,128], index: 0, kind: input, shape index: {}]   ;;  %s1055_s1 = inlined_call_operand.hbm [shape: bf16[2,128,128], index: 1, kind: input, shape index: {}]   ;;  %s1056_s2 = inlined_call_operand.vmem [shape: f32[2,1,128], index: 2, kind: input, shape index: {}]   ;;  %s1057_s3 = inlined_call_operand.hbm [shape: f32[2,8,128], index: 3, kind: output, shape index: {}]  }
   0x1   :  { %10 = vsyncpa [#allocation3 + $0x1], 0 }
   0x2   :  { %11 = vsyncpa [#allocation6], 0 }
   0x3   :  { %13 = vsyncpa [#allocation6 + $0x1], 0 }
   0x4   :  { %14 = vsyncpa [#allocation4], 0 }
   0x5   :  { %16 = vsyncpa [#allocation4 + $0x1], 0  ;;  %s822_s12 = smov 0   ;;  %s824_s13 = smov 0  }
   0x6   :  { %s826_s14 = smov 0   ;;  %s828_s15 = smov 0  }
   0x7   :  { %s830_s16 = smov 0   ;;  %s832_s17 = smov 0  }
   0x8 LB: > { %s508_s18 = sadd.s32 4294967295, %s793_s17   ;;  %s509_s19 = sadd.s32 4294967294, %s793_s17   ;;  %s793_s17 = sphi %s832_s17, %s22_s17   ;;  %s789_s16 = sphi %s830_s16, %s1076_s16   ;;  %s785_s15 = sphi %s828_s15, %s1075_s15   ;;  %s781_s14 = sphi %s826_s14, %s1074_s14   ;;  %s777_s13 = sphi %s824_s13, %s1073_s13   ;;  %s773_s12 = sphi %s822_s12, %s1072_s12  }
   0x9   : > { %s34_s20 = sadd.s32 1, %s789_s16  ;;  %s43_s21 = sadd.s32 1, %s781_s14 }
   0xa   : > { %p36_p0 = scmp.ge.s32.totalorder %s34_s20, 2  ;;  %p50_p1 = scmp.ne.s32.totalorder %s781_s14, %s777_s13 }
   0xb   : > { %p51_p2 = scmp.eq.s32.totalorder %s793_s17, 0  ;;  %p56_p3 = scmp.ne.s32.totalorder %s777_s13, %s773_s12 }
   0xc   : > { %s1078_s20 = smov (%p36_p0, %s34_s20), 0  ;;  %p57_p5 = scmp.eq.s32.totalorder %s508_s18, 0 }
   0xd   : > { %p863_p4 = por %p51_p2, %p50_p1  ;;  %s38_s23 = ssub.s32 %s789_s16, %s1078_s20 }
   0xe   : > { %p134_p6 = scmp.eq.s32.totalorder %s508_s18, 1  ;;  %p41_p7 = scmp.eq.s32.totalorder %s38_s23, 0 }
   0xf   : > { %p869_p8 = por %p57_p5, %p56_p3  ;;  %p140_p10 = scmp.eq.s32.totalorder %s509_s19, 1 }
  0x10   : > { %p873_p9 = por %p134_p6, %p50_p1  ;;  %p581_p13 = scmp.lt.s32.totalorder %s793_s17, 2 }
  0x11   : > { %s1061_s24 = scalar_select %p869_p8, 1, 0 }
  0x12   : > { %s1062_s25 = scalar_select %p873_p9, 1, 0 }
  0x13   : > { %s878_s26 = scalar_select %p41_p7, %s781_s14, %s43_s21  }
  0x14   : > { %p880_p11 = por %p140_p10, %p56_p3  ;;  %s887_s28 = sand.u32 1, %s781_s14  }
  0x15   : > { %s512_s29 = sshll.u32 %s887_s28, 2  ;;  %s513_s30 = sshll.u32 %s789_s16, 6 }
  0x16   : > { %s1063_s27 = scalar_select %p880_p11, 1, 0 }
  0x17   : > { %s894_s6 = scalar_lea.hbm %s1054_s0, %s513_s30  ;;  %s164_s7 = scalar_lea.vmem [#allocation2], %s512_s29 }
  0x18   : > { %s172_s8 = sshll.u32 %s164_s7, 4  ;;  %p900_p0 = pnand %p581_p13, %p863_p4  ;;  %s896_s8 = int_to_ptr.vmem [resolvable:$true] %s172_s8 }
  0x19   : > { %s161_s10 = scalar_lea.sflag [#allocation3], %s887_s28  ;;  %s647_s11 = scalar_lea.hbm %s894_s6, 64 }
  0x1a   : > { %p648_p3 = scmp.ne.s32.totalorder %s894_s6, %s647_s11  ;;  %p649_p5 = pneg %p900_p0 }
  0x1b   : > { %s652_s21 = scalar_lea.hbm %s1054_s0, 128  ;;  %p653_p4 = scmp.lt.u32.totalorder %s894_s6, %s1054_s0 }
  0x1c   : > { %p650_p6 = pnand %p649_p5, %p648_p3  ;;  %p654_p10 = scmp.lt.u32.totalorder %s652_s21, %s647_s11 }
  0x1d   : > { %p656_p12 = scmp.lt.u32.totalorder %s647_s11, %s894_s6 }
  0x1e   : > { %p651_p7 = pneg %p650_p6  ;;  %p655_p13 = por %p654_p10, %p653_p4 }
  0x20   : > { %p657_p1 = por %p656_p12, %p655_p13 }
  0x22   : > { %p658_p2 = pnand %p657_p1, %p651_p7 }
  0x24   : > { %661 = shalt.err (!%p658_p2)
}
  0x25   : > { %s662_s29 = scalar_lea.vmem %s896_s8, 64  ;;  %s795_s30 = smov [#allocation2]  }
  0x26   : > { %p663_p3 = scmp.ne.s32.totalorder %s896_s8, %s662_s29  ;;  %s667_s4 = sshll.u32 %s795_s30, 4  ;;  %s668_s4 = int_to_ptr.vmem [resolvable:$false] %s667_s4 }
  0x27   : > { %s669_s5 = scalar_lea.vmem %s668_s4, 128  ;;  %p670_p9 = scmp.lt.s32.totalorder %s896_s8, %s668_s4 }
  0x28   : > { %p665_p6 = pnand %p663_p3, %p649_p5  ;;  %p671_p4 = scmp.lt.s32.totalorder %s669_s5, %s662_s29 }
  0x2a   : > { %p666_p11 = pneg %p665_p6  ;;  %p672_p10 = por %p671_p4, %p670_p9 }
  0x2c   : > { %p673_p12 = pnand %p672_p10, %p666_p11 }
  0x2e   : > { %676 = shalt.err (!%p673_p12)
}
  0x2f   : > { %573 = dma.hbm_to_vmem [thread:$0]  (!%p900_p0), %s894_s6, 64, %s896_s8, %s161_s10  }
  0x30   : > { %p1065_p1 = scmp.lt.s32.totalorder %s793_s17, 3  ;;  %p1066_p2 = scmp.ge.s32.totalorder %s793_s17, 1 }
  0x31   : > { %s514_s11 = sshll.u32 %s887_s28, 6  ;;  %s534_s18 = sshll.u32 %s789_s16, 10 }
  0x32   : > { %p936_p7 = pnand %p1066_p2, %p1065_p1  ;;  %s945_s22 = scalar_lea.hbm %s1055_s1, %s534_s18 }
  0x33   : > { %s183_s23 = scalar_lea.vmem [#allocation5], %s514_s11  ;;  %s180_s6 = scalar_lea.sflag [#allocation6], %s887_s28 }
  0x34   : > { %s190_s29 = sshll.u32 %s183_s23, 4  ;;  %s677_s8 = scalar_lea.hbm %s945_s22, 1024  ;;  %s947_s29 = int_to_ptr.vmem [resolvable:$true] %s190_s29 }
  0x35   : > { %p678_p9 = scmp.ne.s32.totalorder %s945_s22, %s677_s8  ;;  %s682_s4 = scalar_lea.hbm %s1055_s1, 2048 }
  0x36   : > { %p683_p3 = scmp.lt.u32.totalorder %s945_s22, %s1055_s1  ;;  %p684_p6 = scmp.lt.u32.totalorder %s682_s4, %s677_s8 }
  0x37   : > { %p680_p11 = pnand %p678_p9, %p649_p5  ;;  %p686_p10 = scmp.lt.u32.totalorder %s677_s8, %s945_s22 }
  0x38   : > { %p685_p4 = por %p684_p6, %p683_p3 }
  0x39   : > { %p681_p13 = pneg %p680_p11 }
  0x3a   : > { %p687_p12 = por %p686_p10, %p685_p4 }
  0x3c   : > { %p688_p1 = pnand %p687_p12, %p681_p13 }
  0x3e   : > { %691 = shalt.err (!%p688_p1)
}
  0x3f   : > { %s692_s11 = scalar_lea.vmem %s947_s29, 1024  ;;  %s796_s19 = smov [#allocation5]  }
  0x40   : > { %p693_p2 = scmp.ne.s32.totalorder %s947_s29, %s692_s11  ;;  %s697_s21 = sshll.u32 %s796_s19, 4  ;;  %s698_s21 = int_to_ptr.vmem [resolvable:$false] %s697_s21 }
  0x41   : > { %s699_s23 = scalar_lea.vmem %s698_s21, 2048  ;;  %p700_p8 = scmp.lt.s32.totalorder %s947_s29, %s698_s21 }
  0x42   : > { %p695_p9 = pnand %p693_p2, %p649_p5  ;;  %p701_p3 = scmp.lt.s32.totalorder %s699_s23, %s692_s11 }
  0x44   : > { %p696_p11 = pneg %p695_p9  ;;  %p702_p6 = por %p701_p3, %p700_p8 }
  0x46   : > { %p703_p4 = pnand %p702_p6, %p696_p11 }
  0x48   : > { %706 = shalt.err (!%p703_p4)
}
  0x49   : > { %s797_s8 = smov 64   ;;  %s798_s10 = smov 4  }
  0x4a   : > { %576 = dma.hbm_to_vmem [thread:$0]  (!%p900_p0), %s945_s22, 1024, %s947_s29, %s180_s6, %s797_s8, %s797_s8, %s798_s10  }
  0x4b   : > { %208 = sbr.rel (%p936_p7) target bundleno = 661 (0x295), region = 32  ;;  %s978_s30 = sand.u32 (!%p936_p7), 1, %s777_s13  }
  0x4c   : > { %s518_s4 = sshll.u32 (!%p936_p7), %s978_s30, 2  ;;  %s211_s5 = scalar_lea.sflag (!%p936_p7), [#allocation3], %s978_s30 }
  0x4d   : > { %s982_s18 = scalar_lea.vmem (!%p936_p7), [#allocation2], %s518_s4  ;;  %p1068_p8 = scmp.ne.s32.totalorder (!%p936_p7), %s1061_s24, 0 }
  0x52   : > { %760 = dma.done.wait (%p1068_p8), %s211_s5, 64  }
  0x53   : > { %762 = vsyncadd (%p1068_p8), %s211_s5, 4294967232  ;;  %s519_s28 = sshll.u32 %s978_s30, 6  ;;  %s220_s9 = scalar_lea.sflag [#allocation6], %s978_s30 }
  0x54   : > { %s223_s7 = scalar_lea.vmem [#allocation5], %s519_s28 }
  0x55   : > { %764 = dma.done.wait (%p1068_p8), %s220_s9, 1024  }
  0x56   : > { %766 = vsyncadd (%p1068_p8), %s220_s9, 4294966272  ;;  %v799_v0 = vmov 0.0   ;;  %vm800_vm0 = vmmov 0   ;;  %v635_v1 = vld [vmem:[%s223_s7] sm:$0xff]   ;;  %v636_v2 = vld [vmem:[%s223_s7 + $0x8] sm:$0xff]   ;;  %p254_p0 = scmp.lt.s32.totalorder %s785_s15, 1 }
  0x57   : > { %544 = vmatprep.subr.bf16.mxu0 %v799_v0  ;;  %560 = vmatprep.mubr.msk.bf16.mxu0 %vm800_vm0, %v799_v0  ;;  %v637_v3 = vld [vmem:[%s223_s7 + $0x10] sm:$0xff]   ;;  %v638_v4 = vld [vmem:[%s223_s7 + $0x18] sm:$0xff]   ;;  %v639_v5 = vld [vmem:[%s223_s7 + $0x20] sm:$0xff]   ;;  %s520_s11 = sshll.u32 %s978_s30, 3  ;;  %s531_s19 = sshll.u32 %s785_s15, 7 }
  0x58   : > { %545 = vmatpush3.bf16.msra.mxu0 %v635_v1  ;;  %v640_v6 = vld [vmem:[%s223_s7 + $0x28] sm:$0xff]   ;;  %v641_v7 = vld [vmem:[%s223_s7 + $0x30] sm:$0xff]   ;;  %v642_v8 = vld [vmem:[%s223_s7 + $0x38] sm:$0xff]   ;;  %s255_s24 = scalar_select %p254_p0, %s785_s15, 1 }
  0x59   : > { %546 = vmatprep.subr.bf16.mxu0 %v799_v0  ;;  %v258_v9 = vld [vmem:[%s982_s18] sm:$0xf]  ;;  %s253_s21 = scalar_lea.vmem [#allocation7], %s520_s11  ;;  %s1005_s4 = scalar_lea.hbm %s1057_s3, %s531_s19 }
  0x5a   : > { %s256_s6 = scalar_lea.vmem %s1056_s2, %s255_s24  ;;  %s396_s23 = sshll.u32 %s253_s21, 4  ;;  %s1007_s23 = int_to_ptr.vmem [resolvable:$true] %s396_s23 }
  0x5b   : > { %v521_v10 = vld [vmem:[%s256_s6] ss:$0 sm:$0xff]  ;;  %s382_s5 = scalar_lea.sflag [#allocation4], %s978_s30  ;;  %s707_s18 = scalar_lea.vmem %s1007_s23, 128 }
  0x5c   : > { %547 = vmatpush3.bf16.msra.mxu0 %v636_v2  ;;  %p708_p5 = scmp.ne.s32.totalorder %s1007_s23, %s707_s18  ;;  %p1069_p7 = scmp.ne.s32.totalorder %s1062_s25, 0 }
  0x5d   : > { %548 = vmatprep.subr.bf16.mxu0 %v799_v0  ;;  %s801_s15 = smov [#allocation7]  }
  0x5e   : > { %p709_p13 = pnand %p708_p5, %p1069_p7  ;;  %s711_s28 = sshll.u32 %s801_s15, 4  ;;  %s712_s28 = int_to_ptr.vmem [resolvable:$false] %s711_s28 }
  0x5f   : > { %s713_s9 = scalar_lea.vmem %s712_s28, 256  ;;  %p714_p12 = scmp.lt.s32.totalorder %s1007_s23, %s712_s28 }
  0x60   : > { %549 = vmatpush3.bf16.msra.mxu0 %v637_v3  ;;  %p710_p10 = pneg %p709_p13  ;;  %p715_p1 = scmp.lt.s32.totalorder %s713_s9, %s707_s18 }
  0x61   : > { %550 = vmatprep.subr.bf16.mxu0 %v799_v0 }
  0x62   : > { %p716_p2 = por %p715_p1, %p714_p12 }
  0x64   : > { %551 = vmatpush3.bf16.msra.mxu0 %v638_v4  ;;  %p717_p9 = pnand %p716_p2, %p710_p10 }
  0x65   : > { %552 = vmatprep.subr.bf16.mxu0 %v799_v0 }
  0x68   : > { %553 = vmatpush3.bf16.msra.mxu0 %v639_v5 }
  0x69   : > { %554 = vmatprep.subr.bf16.mxu0 %v799_v0 }
  0x6c   : > { %555 = vmatpush3.bf16.msra.mxu0 %v640_v6 }
  0x6d   : > { %556 = vmatprep.subr.bf16.mxu0 %v799_v0 }
  0x70   : > { %557 = vmatpush3.bf16.msra.mxu0 %v641_v7 }
  0x71   : > { %558 = vmatprep.subr.bf16.mxu0 %v799_v0 }
  0x74   : > { %559 = vmatpush3.bf16.msra.mxu0 %v642_v8 }
  0x77   : > { %561 = vmatmul.mubr.bf16.vlgmr.msra.gmra.mrb[0].mxu0 %v258_v9 }
 0x14a   : > { %v364_v11 = vpop.f32.mrb[0].mxu0 }
 0x14b   : > { %v365_v12 = vadd.f32 %v521_v10, %v364_v11  ;;  %v562_v13 = vpop.f32.mrb[1].mxu0 }
 0x14c   : > { %v367_v14 = vpop.f32.mrb[2].mxu0 }
 0x14d   : > { %370 = vmax.xlane.f32.xlu0 %v365_v12  ;;  %v563_v15 = vpop.f32.mrb[3].mxu0 }
 0x1da   : > { %v371_v16 = vpop.xlane.xlu0 %370 }
 0x1db   : > { %v372_v17 = vsub.f32 %v365_v12, %v371_v16 }
 0x1dd   : > { %v373_v18 = vmul.f32 1.442695, %v372_v17 }
 0x1df   : > { %643 = vpow2.f32 %v373_v18 }
 0x1e9   : > { %v644_v19 = vpop.eup %643 }
 0x1ea   : > { %375 = vadd.xlane.f32.xlu0 %v644_v19 }
 0x277   : > { %v376_v20 = vpop.xlane.xlu0 %375 }
 0x278   : > { %645 = vlog2.f32 %v376_v20 }
 0x282   : > { %v646_v21 = vpop.eup %645 }
 0x283   : > { %v378_v22 = vmul.f32 0.6931472, %v646_v21 }
 0x285   : > { %v379_v23 = vsub.f32 %v372_v17, %v378_v22 }
 0x287   : > { %380 = vst [vmem:[%s253_s21] sm:$0xff] %v379_v23 }
 0x288   : > { %720 = shalt.err (!%p717_p9)
}
 0x289   : > { %s721_s30 = scalar_lea.hbm %s1005_s4, 128  ;;  %s725_s22 = scalar_lea.hbm %s1057_s3, 256 }
 0x28a   : > { %p722_p11 = scmp.ne.s32.totalorder %s1005_s4, %s721_s30  ;;  %p726_p4 = scmp.lt.u32.totalorder %s1005_s4, %s1057_s3 }
 0x28b   : > { %p727_p8 = scmp.lt.u32.totalorder %s725_s22, %s721_s30  ;;  %p729_p5 = scmp.lt.u32.totalorder %s721_s30, %s1005_s4 }
 0x28c   : > { %p723_p3 = pnand %p722_p11, %p1069_p7 }
 0x28d   : > { %p728_p0 = por %p727_p8, %p726_p4 }
 0x28e   : > { %p724_p6 = pneg %p723_p3 }
 0x28f   : > { %p730_p13 = por %p729_p5, %p728_p0 }
 0x291   : > { %p731_p10 = pnand %p730_p13, %p724_p6 }
 0x293   : > { %734 = shalt.err (!%p731_p10)
}
 0x294   : > { %568 = dma.vmem_to_hbm [thread:$0]  (%p1069_p7), %s1007_s23, 128, %s1005_s4, %s382_s5  }
 0x295 PF: > { %s408_s11 = sand.u32 1, %s773_s12   ;;  %p1070_p12 = scmp.ne.s32.totalorder %s1063_s27, 0 }
 0x296   : > { %p1071_p1 = scmp.ge.s32.totalorder %s793_s17, 2  ;;  %s409_s19 = scalar_lea.sflag [#allocation4], %s408_s11 }
 0x298   : > { %p578_p2 = pnand %p1071_p1, %p1070_p12 }
 0x29a   : > { %768 = dma.done.wait (!%p578_p2), %s409_s19, 128  }
 0x29b   : > { %770 = vsyncadd (!%p578_p2), %s409_s19, 4294967168  ;;  %s22_s17 = sadd.s32 1, %s793_s17   ;;  %s1072_s12 = smov %s777_s13 }
 0x29c   : > { %p19_p9 = scmp.ge.s32.totalorder %s22_s17, 4   ;;  %s1073_s13 = smov %s781_s14 }
 0x29d   : > { %s1074_s14 = smov %s878_s26  ;;  %s1075_s15 = smov %s789_s16 }
 0x29e   : > { %s1076_s16 = smov %s1078_s20  ;;  %21 = sbr.rel (!%p19_p9) target bundleno = 8 (0x8), region = 93 }
 0x2a5   :  { %414 = vsyncpa [#allocation3], 1 }
 0x2a6   :  { %416 = vsyncpa [#allocation3 + $0x1], 1 }
 0x2a7   :  { %417 = vsyncpa [#allocation6], 1 }
 0x2a8   :  { %419 = vsyncpa [#allocation6 + $0x1], 1 }
 0x2a9   :  { %420 = vsyncpa [#allocation4], 1 }
 0x2aa   :  { %422 = vsyncpa [#allocation4 + $0x1], 1 }

</bundles_post_ra>
